<compile_context>
chip_gen: v6e
topology: v6e:2x2x1
jax: 0.10.0
libtpu: 0.0.40
codegen_flags: <defaults>
</compile_context>

<pallas_src>
import functools

import jax
import jax.numpy as jnp
import numpy as np
from jax.experimental import pallas as pl
from jax.experimental.pallas import tpu as pltpu


# ----------------------------------------------------------------------------
# Host-side weight preparation (once per parameter set).
# ----------------------------------------------------------------------------
def _build_conv_weight(w1, W):
    """(3,3,Cin,Cmid) HWIO conv3x3 weight -> banded (3*W*Cin, W*Cmid).

    K rows ordered (row-tap r=kh, input col j, ci); columns ordered (n, c).
    The conv's column zero-padding is baked in: out-of-range input columns
    simply get zero weight rows, so the kernel LHS needs no column padding.
    """
    _, _, Cin, Cmid = w1.shape
    Z = jnp.zeros((3, W, Cin, W, Cmid), jnp.float32)
    for kh in range(3):
        for kw in range(3):
            # output column n reads input column j = n + kw - 1; keep 0<=j<W
            n0, n1 = max(0, 1 - kw), min(W, W + 1 - kw)
            n = jnp.arange(n0, n1)
            Z = Z.at[kh, n + kw - 1, :, n, :].set(w1[kh, kw].astype(jnp.float32))
    return Z.reshape(3 * W * Cin, W * Cmid)


def _build_deconv_weight(w2, W):
    """(4,4,Cmid,Cout) deconv weight -> banded (3*W*Cmid, 2*2*W*Cout).

    ConvTranspose2d(k=4, s=2, p=1) decomposed into output phases (p, q):
      out[2m+p, 2n+q] = sum_{dr,dc in {0,1}}
                          y[m+p+dr-1, n+q+dc-1] * w2[3-p-2dr, 3-q-2dc]
    K rows ordered (row-tap r=p+dr, input col j, ci); output columns ordered
    (p, n, q, co) so both row phases are one N=2*2*W*Cout matmul and the
    kernel output reshapes to (2H, 2W, Cout) with a pure reshape.  Column
    padding is baked in (zero rows for out-of-range j).

    NOTE: w2 here is (kh, kw, Cin, Cout).  A real PyTorch ConvTranspose2d
    weight is stored (Cin, Cout, kh, kw): convert with .permute(2, 3, 0, 1),
    NO spatial flip.
    """
    _, _, Cmid, Cout = w2.shape
    Z = jnp.zeros((3, W, Cmid, 2, W, 2, Cout), jnp.float32)
    for p in range(2):
        for dr in range(2):
            r = p + dr
            kh = 3 - p - 2 * dr
            for q in range(2):
                for dc in range(2):
                    kw = 3 - q - 2 * dc
                    # output cols (n, q) read input col j = n + q + dc - 1
                    n0, n1 = max(0, 1 - q - dc), min(W, W + 1 - q - dc)
                    n = jnp.arange(n0, n1)
                    Z = Z.at[r, n + q + dc - 1, :, p, n, q, :].set(
                        w2[kh, kw].astype(jnp.float32))
    return Z.reshape(3 * W * Cmid, 2 * 2 * W * Cout)


# ----------------------------------------------------------------------------
# Kernel
# ----------------------------------------------------------------------------
def decoder_block_kernel(x_ref, w1_ref, b1_ref, w2_ref, b2_ref, o_ref,
                         xcat_ref, ycat_ref, *, B, H, W, Cin, Cmid, Cout):
    f32, bf16 = jnp.float32, jnp.bfloat16
    K1 = W * Cin                 # per-row-tap K for the conv
    K2 = W * Cmid                # per-row-tap K for the deconv
    NOUT = 2 * 2 * W * Cout      # output lanes, ordered (p, n, q, co)

    # ---- stage 1: conv3x3 (pad=1) + bias + ReLU ------------------------------
    # Build the K-concatenated LHS   lhs1[b, m, (r, j, ci)] = x_pad[b, m+r-1]
    # by storing the (already bf16) input at three row-shifted lane blocks.
    # The 2 out-of-range rows are zeroed EVERY grid step: scratch persists and
    # each TensorCore owns its own scratch, so do NOT guard on program_id.
    xv = x_ref[...]                                        # (B, H, K1) bf16
    xcat_ref[:, 0:1, 0:K1] = jnp.zeros((B, 1, K1), bf16)
    xcat_ref[:, 1:H, 0:K1] = xv[:, 0:H - 1, :]             # row tap r=0 (kh=0)
    xcat_ref[:, :, K1:2 * K1] = xv                         # row tap r=1 (kh=1)
    xcat_ref[:, 0:H - 1, 2 * K1:3 * K1] = xv[:, 1:H, :]    # row tap r=2 (kh=2)
    xcat_ref[:, H - 1:H, 2 * K1:3 * K1] = jnp.zeros((B, 1, K1), bf16)

    lhs1 = xcat_ref[...].reshape(B * H, 3 * K1)            # one aligned read
    y = jnp.dot(lhs1, w1_ref[...], preferred_element_type=f32)
    y = jnp.maximum(y + b1_ref[...], 0.0)                  # (B*H, W*Cmid) f32

    # ---- stage 2: ConvTranspose2d(k=4, s=2, p=1) + bias + ReLU ---------------
    yb = y.reshape(B, H, K2).astype(bf16)                  # cast once
    ycat_ref[:, 0:1, 0:K2] = jnp.zeros((B, 1, K2), bf16)
    ycat_ref[:, 1:H, 0:K2] = yb[:, 0:H - 1, :]             # row tap r=0
    ycat_ref[:, :, K2:2 * K2] = yb                         # row tap r=1
    ycat_ref[:, 0:H - 1, 2 * K2:3 * K2] = yb[:, 1:H, :]    # row tap r=2
    ycat_ref[:, H - 1:H, 2 * K2:3 * K2] = jnp.zeros((B, 1, K2), bf16)

    lhs2 = ycat_ref[...].reshape(B * H, 3 * K2)            # one aligned read
    z = jnp.dot(lhs2, w2_ref[...], preferred_element_type=f32)
    z = jnp.maximum(z + b2_ref[...], 0.0)                  # (B*H, NOUT) f32
    # lane-dense (multiple of 128), unmasked store
    o_ref[...] = z.reshape(B, H, NOUT)


# ----------------------------------------------------------------------------
# Wrapper
# ----------------------------------------------------------------------------
def _pick_image_batch(N, H):
    """Largest divisor B of N with B*H <= 128 (target M ~ 128 rows per matmul)."""
    target = max(1, 128 // max(H, 1))
    best = 1
    for cand in range(1, min(N, target) + 1):
        if N % cand == 0:
            best = cand
    return best


def decoder_block_forward(x_nchw, params):
    """DecoderBlock forward.  x_nchw: (N, Cin, H, W) -> (N, Cout, 2H, 2W)."""
    w1, b1, w2, b2 = params
    x = jnp.transpose(x_nchw, (0, 2, 3, 1))                 # NCHW -> NHWC
    N, H, W, Cin = x.shape
    Cmid = w1.shape[3]
    Cout = w2.shape[3]

    # channels fused into lanes; bf16 on the host halves the per-step input DMA
    x2 = x.reshape(N, H, W * Cin).astype(jnp.bfloat16)

    w1b = _build_conv_weight(w1, W).astype(jnp.bfloat16)    # (3*W*Cin, W*Cmid)
    w2b = _build_deconv_weight(w2, W).astype(jnp.bfloat16)  # (3*W*Cmid, 4*W*Cout)
    b1r = jnp.tile(b1.astype(jnp.float32), W).reshape(1, W * Cmid)
    b2r = jnp.tile(b2.astype(jnp.float32), 2 * 2 * W).reshape(1, 4 * W * Cout)

    B = _pick_image_batch(N, H)          # images per grid step (M = B*H rows)
    grid = (N // B,)

    kernel = functools.partial(decoder_block_kernel,
                               B=B, H=H, W=W, Cin=Cin, Cmid=Cmid, Cout=Cout)

    # VMEM budget from the actual (double-buffered) block sizes + scratch.
    blocks = 2 * (B * H * W * Cin * 2                       # x (bf16)
                  + 3 * W * Cin * W * Cmid * 2              # w1 (bf16)
                  + W * Cmid * 4                            # b1 (f32)
                  + 3 * W * Cmid * 4 * W * Cout * 2         # w2 (bf16)
                  + 4 * W * Cout * 4                        # b2 (f32)
                  + B * H * 4 * W * Cout * 4)               # out (f32)
    scratch = B * H * 3 * W * Cin * 2 + B * H * 3 * W * Cmid * 2
    vmem_limit = max(8 * 1024 * 1024, 2 * (blocks + scratch))

    out = pl.pallas_call(
        kernel,
        out_shape=jax.ShapeDtypeStruct((N, H, 4 * W * Cout), jnp.float32),
        grid_spec=pltpu.PrefetchScalarGridSpec(
            num_scalar_prefetch=0,
            grid=grid,                      # B images per step
            in_specs=[
                pl.BlockSpec((B, H, W * Cin), lambda i: (i, 0, 0)),
                pl.BlockSpec((3 * W * Cin, W * Cmid), lambda i: (0, 0)),
                pl.BlockSpec((1, W * Cmid), lambda i: (0, 0)),
                pl.BlockSpec((3 * W * Cmid, 4 * W * Cout), lambda i: (0, 0)),
                pl.BlockSpec((1, 4 * W * Cout), lambda i: (0, 0)),
            ],
            out_specs=pl.BlockSpec((B, H, 4 * W * Cout), lambda i: (i, 0, 0)),
            scratch_shapes=[
                pltpu.VMEM((B, H, 3 * W * Cin), jnp.bfloat16),   # conv LHS
                pltpu.VMEM((B, H, 3 * W * Cmid), jnp.bfloat16),  # deconv LHS
            ],
        ),
        compiler_params=pltpu.CompilerParams(
            dimension_semantics=("parallel",),
            vmem_limit_bytes=int(vmem_limit),
        ),
    )(x2, w1b, b1r, w2b, b2r)

    # rows are m, lanes are (p, n, q, co) -> (N, 2H, 2W, Cout) is a PURE reshape
    out = out.reshape(N, 2 * H, 2 * W, Cout)
    return jnp.transpose(out, (0, 3, 1, 2))                 # NHWC -> NCHW


# ----------------------------------------------------------------------------
# Pure-JAX reference and test harness
# ----------------------------------------------------------------------------
def reference_forward(x_nchw, params):
    """Pure-JAX f32 reference (conv + transposed conv via lax)."""
    w1, b1, w2, b2 = params
    dn = ('NHWC', 'HWIO', 'NHWC')
    x = jnp.transpose(x_nchw, (0, 2, 3, 1)).astype(jnp.float32)
    y = jax.lax.conv_general_dilated(x, w1, (1, 1), ((1, 1), (1, 1)),
                                     dimension_numbers=dn) + b1
    y = jnp.maximum(y, 0.0)
    # transposed conv == conv over stride-dilated input with flipped kernel
    w2f = w2[::-1, ::-1, :, :]
    z = jax.lax.conv_general_dilated(y, w2f, (1, 1), ((2, 2), (2, 2)),
                                     lhs_dilation=(2, 2),
                                     dimension_numbers=dn) + b2
    z = jnp.maximum(z, 0.0)
    return jnp.transpose(z, (0, 3, 1, 2))


def init_params(key, in_channels, middle_channels, out_channels):
    k1, k2, k3, k4 = jax.random.split(key, 4)
    w1 = jax.random.normal(k1, (3, 3, in_channels, middle_channels),
                           jnp.float32) * 0.1   # conv3x3 weight, HWIO
    b1 = jax.random.normal(k2, (middle_channels,), jnp.float32) * 0.1
    w2 = jax.random.normal(k3, (4, 4, middle_channels, out_channels),
                           jnp.float32) * 0.1   # deconv weight (kh,kw,Cin,Cout)
    b2 = jax.random.normal(k4, (out_channels,), jnp.float32) * 0.1
    return (w1, b1, w2, b2)


if __name__ == "__main__":
    N, Cin, Cmid, Cout, H, W = 2, 4, 8, 4, 16, 16

    key = jax.random.PRNGKey(0)
    kx, kp = jax.random.split(key)
    x = jax.random.normal(kx, (N, Cin, H, W), jnp.float32)  # NCHW, like PyTorch
    params = init_params(kp, Cin, Cmid, Cout)

    out = jax.block_until_ready(decoder_block_forward(x, params))
    ref = jax.block_until_ready(reference_forward(x, params))

    assert out.shape == (N, Cout, 2 * H, 2 * W), out.shape
    # bf16 matmul operands (f32 accumulate) -> compare with a bf16-level tolerance
    np.testing.assert_allclose(np.asarray(out), np.asarray(ref),
                               rtol=2e-2, atol=2e-2)

    print("KERNEL_OK")
</pallas_src>

<mosaic_0001>
module attributes {stable_mosaic.version = 11 : i64} {
  func.func @decoder_block_kernel(%arg0: i32, %arg1: memref<2x16x64xbf16, #tpu.memory_space<vmem>>, %arg2: memref<192x128xbf16, #tpu.memory_space<vmem>>, %arg3: memref<1x128xf32, #tpu.memory_space<vmem>>, %arg4: memref<384x256xbf16, #tpu.memory_space<vmem>>, %arg5: memref<1x256xf32, #tpu.memory_space<vmem>>, %arg6: memref<2x16x256xf32, #tpu.memory_space<vmem>>, %arg7: memref<2x16x192xbf16, #tpu.memory_space<vmem>>, %arg8: memref<2x16x384xbf16, #tpu.memory_space<vmem>>) attributes {dimension_semantics = [#tpu.dimension_semantics<parallel>], iteration_bounds = array<i64: 1>, scalar_prefetch = 0 : i64, scratch_operands = 2 : i64, tpu.core_type = #tpu.core_type<tc>, window_params = [{transform_indices = @transform_0, window_bounds = array<i64: 2, 16, 64>}, {pipeline_mode = #tpu.pipeline_mode<synchronous>, transform_indices = @transform_1, window_bounds = array<i64: 192, 128>}, {pipeline_mode = #tpu.pipeline_mode<synchronous>, transform_indices = @transform_2, window_bounds = array<i64: 1, 128>}, {pipeline_mode = #tpu.pipeline_mode<synchronous>, transform_indices = @transform_3, window_bounds = array<i64: 384, 256>}, {pipeline_mode = #tpu.pipeline_mode<synchronous>, transform_indices = @transform_4, window_bounds = array<i64: 1, 256>}, {transform_indices = @transform_5, window_bounds = array<i64: 2, 16, 256>}]} {
    %c0 = arith.constant 0 : index
    %c0_0 = arith.constant 0 : index
    %c0_1 = arith.constant 0 : index
    %0 = vector.load %arg1[%c0, %c0_0, %c0_1] : memref<2x16x64xbf16, #tpu.memory_space<vmem>>, vector<2x16x64xbf16>
    %cst = arith.constant 0.000000e+00 : bf16
    %1 = vector.broadcast %cst : bf16 to vector<2x1x64xbf16>
    %c0_2 = arith.constant 0 : index
    %c0_3 = arith.constant 0 : index
    %c0_4 = arith.constant 0 : index
    %2 = vector.load %arg7[%c0_2, %c0_3, %c0_4] : memref<2x16x192xbf16, #tpu.memory_space<vmem>>, vector<2x1x64xbf16>
    tpu.vector_store %arg7[%c0_2, %c0_3, %c0_4], %1 {strides = array<i32>} : memref<2x16x192xbf16, #tpu.memory_space<vmem>>, vector<2x1x64xbf16>,
    %3 = vector.extract_strided_slice %0 {offsets = [0, 0, 0], sizes = [2, 15, 64], strides = [1, 1, 1]} : vector<2x16x64xbf16> to vector<2x15x64xbf16>
    %c0_5 = arith.constant 0 : index
    %c1 = arith.constant 1 : index
    %c0_6 = arith.constant 0 : index
    %4 = vector.load %arg7[%c0_5, %c1, %c0_6] : memref<2x16x192xbf16, #tpu.memory_space<vmem>>, vector<2x15x64xbf16>
    tpu.vector_store %arg7[%c0_5, %c1, %c0_6], %3 {strides = array<i32>} : memref<2x16x192xbf16, #tpu.memory_space<vmem>>, vector<2x15x64xbf16>,
    %c0_7 = arith.constant 0 : index
    %c0_8 = arith.constant 0 : index
    %c64 = arith.constant 64 : index
    %5 = vector.load %arg7[%c0_7, %c0_8, %c64] : memref<2x16x192xbf16, #tpu.memory_space<vmem>>, vector<2x16x64xbf16>
    tpu.vector_store %arg7[%c0_7, %c0_8, %c64], %0 {strides = array<i32>} : memref<2x16x192xbf16, #tpu.memory_space<vmem>>, vector<2x16x64xbf16>,
    %6 = vector.extract_strided_slice %0 {offsets = [0, 1, 0], sizes = [2, 15, 64], strides = [1, 1, 1]} : vector<2x16x64xbf16> to vector<2x15x64xbf16>
    %c0_9 = arith.constant 0 : index
    %c0_10 = arith.constant 0 : index
    %c128 = arith.constant 128 : index
    %7 = vector.load %arg7[%c0_9, %c0_10, %c128] : memref<2x16x192xbf16, #tpu.memory_space<vmem>>, vector<2x15x64xbf16>
    tpu.vector_store %arg7[%c0_9, %c0_10, %c128], %6 {strides = array<i32>} : memref<2x16x192xbf16, #tpu.memory_space<vmem>>, vector<2x15x64xbf16>,
    %cst_11 = arith.constant 0.000000e+00 : bf16
    %8 = vector.broadcast %cst_11 : bf16 to vector<2x1x64xbf16>
    %c0_12 = arith.constant 0 : index
    %c15 = arith.constant 15 : index
    %c128_13 = arith.constant 128 : index
    %9 = vector.load %arg7[%c0_12, %c15, %c128_13] : memref<2x16x192xbf16, #tpu.memory_space<vmem>>, vector<2x1x64xbf16>
    tpu.vector_store %arg7[%c0_12, %c15, %c128_13], %8 {strides = array<i32>} : memref<2x16x192xbf16, #tpu.memory_space<vmem>>, vector<2x1x64xbf16>,
    %c0_14 = arith.constant 0 : index
    %c0_15 = arith.constant 0 : index
    %c0_16 = arith.constant 0 : index
    %10 = vector.load %arg7[%c0_14, %c0_15, %c0_16] : memref<2x16x192xbf16, #tpu.memory_space<vmem>>, vector<2x16x192xbf16>
    %11 = vector.shape_cast %10 : vector<2x16x192xbf16> to vector<32x192xbf16>
    %c0_17 = arith.constant 0 : index
    %c0_18 = arith.constant 0 : index
    %12 = vector.load %arg2[%c0_17, %c0_18] : memref<192x128xbf16, #tpu.memory_space<vmem>>, vector<192x128xbf16>
    %cst_19 = arith.constant dense<0.000000e+00> : vector<32x128xf32>
    %13 = tpu.matmul %11, %12, %cst_19 {dimension_numbers = #tpu.dot_dimension_numbers<[1], [0], [0], [1], [0, 0, 1, 1], [], []>} : vector<32x192xbf16>, vector<192x128xbf16>, vector<32x128xf32> -> vector<32x128xf32>
    %c0_20 = arith.constant 0 : index
    %c0_21 = arith.constant 0 : index
    %14 = vector.load %arg3[%c0_20, %c0_21] : memref<1x128xf32, #tpu.memory_space<vmem>>, vector<1x128xf32>
    %15 = vector.broadcast %14 : vector<1x128xf32> to vector<32x128xf32>
    %16 = arith.addf %13, %15 : vector<32x128xf32>
    %cst_22 = arith.constant 0.000000e+00 : f32
    %17 = vector.broadcast %cst_22 : f32 to vector<32x128xf32>
    %18 = arith.maximumf %16, %17 : vector<32x128xf32>
    %19 = vector.shape_cast %18 : vector<32x128xf32> to vector<2x16x128xf32>
    %20 = arith.truncf %19 : vector<2x16x128xf32> to vector<2x16x128xbf16>
    %cst_23 = arith.constant 0.000000e+00 : bf16
    %21 = vector.broadcast %cst_23 : bf16 to vector<2x1x128xbf16>
    %c0_24 = arith.constant 0 : index
    %c0_25 = arith.constant 0 : index
    %c0_26 = arith.constant 0 : index
    %22 = vector.load %arg8[%c0_24, %c0_25, %c0_26] : memref<2x16x384xbf16, #tpu.memory_space<vmem>>, vector<2x1x128xbf16>
    tpu.vector_store %arg8[%c0_24, %c0_25, %c0_26], %21 {strides = array<i32>} : memref<2x16x384xbf16, #tpu.memory_space<vmem>>, vector<2x1x128xbf16>,
    %23 = vector.extract_strided_slice %20 {offsets = [0, 0, 0], sizes = [2, 15, 128], strides = [1, 1, 1]} : vector<2x16x128xbf16> to vector<2x15x128xbf16>
    %c0_27 = arith.constant 0 : index
    %c1_28 = arith.constant 1 : index
    %c0_29 = arith.constant 0 : index
    %24 = vector.load %arg8[%c0_27, %c1_28, %c0_29] : memref<2x16x384xbf16, #tpu.memory_space<vmem>>, vector<2x15x128xbf16>
    tpu.vector_store %arg8[%c0_27, %c1_28, %c0_29], %23 {strides = array<i32>} : memref<2x16x384xbf16, #tpu.memory_space<vmem>>, vector<2x15x128xbf16>,
    %c0_30 = arith.constant 0 : index
    %c0_31 = arith.constant 0 : index
    %c128_32 = arith.constant 128 : index
    %25 = vector.load %arg8[%c0_30, %c0_31, %c128_32] : memref<2x16x384xbf16, #tpu.memory_space<vmem>>, vector<2x16x128xbf16>
    tpu.vector_store %arg8[%c0_30, %c0_31, %c128_32], %20 {strides = array<i32>} : memref<2x16x384xbf16, #tpu.memory_space<vmem>>, vector<2x16x128xbf16>,
    %26 = vector.extract_strided_slice %20 {offsets = [0, 1, 0], sizes = [2, 15, 128], strides = [1, 1, 1]} : vector<2x16x128xbf16> to vector<2x15x128xbf16>
    %c0_33 = arith.constant 0 : index
    %c0_34 = arith.constant 0 : index
    %c256 = arith.constant 256 : index
    %27 = vector.load %arg8[%c0_33, %c0_34, %c256] : memref<2x16x384xbf16, #tpu.memory_space<vmem>>, vector<2x15x128xbf16>
    tpu.vector_store %arg8[%c0_33, %c0_34, %c256], %26 {strides = array<i32>} : memref<2x16x384xbf16, #tpu.memory_space<vmem>>, vector<2x15x128xbf16>,
    %cst_35 = arith.constant 0.000000e+00 : bf16
    %28 = vector.broadcast %cst_35 : bf16 to vector<2x1x128xbf16>
    %c0_36 = arith.constant 0 : index
    %c15_37 = arith.constant 15 : index
    %c256_38 = arith.constant 256 : index
    %29 = vector.load %arg8[%c0_36, %c15_37, %c256_38] : memref<2x16x384xbf16, #tpu.memory_space<vmem>>, vector<2x1x128xbf16>
    tpu.vector_store %arg8[%c0_36, %c15_37, %c256_38], %28 {strides = array<i32>} : memref<2x16x384xbf16, #tpu.memory_space<vmem>>, vector<2x1x128xbf16>,
    %c0_39 = arith.constant 0 : index
    %c0_40 = arith.constant 0 : index
    %c0_41 = arith.constant 0 : index
    %30 = vector.load %arg8[%c0_39, %c0_40, %c0_41] : memref<2x16x384xbf16, #tpu.memory_space<vmem>>, vector<2x16x384xbf16>
    %31 = vector.shape_cast %30 : vector<2x16x384xbf16> to vector<32x384xbf16>
    %c0_42 = arith.constant 0 : index
    %c0_43 = arith.constant 0 : index
    %32 = vector.load %arg4[%c0_42, %c0_43] : memref<384x256xbf16, #tpu.memory_space<vmem>>, vector<384x256xbf16>
    %cst_44 = arith.constant dense<0.000000e+00> : vector<32x256xf32>
    %33 = tpu.matmul %31, %32, %cst_44 {dimension_numbers = #tpu.dot_dimension_numbers<[1], [0], [0], [1], [0, 0, 1, 1], [], []>} : vector<32x384xbf16>, vector<384x256xbf16>, vector<32x256xf32> -> vector<32x256xf32>
    %c0_45 = arith.constant 0 : index
    %c0_46 = arith.constant 0 : index
    %34 = vector.load %arg5[%c0_45, %c0_46] : memref<1x256xf32, #tpu.memory_space<vmem>>, vector<1x256xf32>
    %35 = vector.broadcast %34 : vector<1x256xf32> to vector<32x256xf32>
    %36 = arith.addf %33, %35 : vector<32x256xf32>
    %cst_47 = arith.constant 0.000000e+00 : f32
    %37 = vector.broadcast %cst_47 : f32 to vector<32x256xf32>
    %38 = arith.maximumf %36, %37 : vector<32x256xf32>
    %39 = vector.shape_cast %38 : vector<32x256xf32> to vector<2x16x256xf32>
    %c0_48 = arith.constant 0 : index
    %c0_49 = arith.constant 0 : index
    %c0_50 = arith.constant 0 : index
    %40 = vector.load %arg6[%c0_48, %c0_49, %c0_50] : memref<2x16x256xf32, #tpu.memory_space<vmem>>, vector<2x16x256xf32>
    tpu.vector_store %arg6[%c0_48, %c0_49, %c0_50], %39 {strides = array<i32>} : memref<2x16x256xf32, #tpu.memory_space<vmem>>, vector<2x16x256xf32>,
    return
  }
  func.func @transform_0(%arg0: i32) -> (i32, i32, i32) {
    %c0_i32 = arith.constant 0 : i32
    %c0_i32_0 = arith.constant 0 : i32
    %c0_i32_1 = arith.constant 0 : i32
    return %arg0, %c0_i32, %c0_i32_0 : i32, i32, i32
  }
  func.func @transform_1(%arg0: i32) -> (i32, i32) {
    %c0_i32 = arith.constant 0 : i32
    %c0_i32_0 = arith.constant 0 : i32
    %c0_i32_1 = arith.constant 0 : i32
    return %c0_i32, %c0_i32_0 : i32, i32
  }
  func.func @transform_2(%arg0: i32) -> (i32, i32) {
    %c0_i32 = arith.constant 0 : i32
    %c0_i32_0 = arith.constant 0 : i32
    %c0_i32_1 = arith.constant 0 : i32
    return %c0_i32, %c0_i32_0 : i32, i32
  }
  func.func @transform_3(%arg0: i32) -> (i32, i32) {
    %c0_i32 = arith.constant 0 : i32
    %c0_i32_0 = arith.constant 0 : i32
    %c0_i32_1 = arith.constant 0 : i32
    return %c0_i32, %c0_i32_0 : i32, i32
  }
  func.func @transform_4(%arg0: i32) -> (i32, i32) {
    %c0_i32 = arith.constant 0 : i32
    %c0_i32_0 = arith.constant 0 : i32
    %c0_i32_1 = arith.constant 0 : i32
    return %c0_i32, %c0_i32_0 : i32, i32
  }
  func.func @transform_5(%arg0: i32) -> (i32, i32, i32) {
    %c0_i32 = arith.constant 0 : i32
    %c0_i32_0 = arith.constant 0 : i32
    %c0_i32_1 = arith.constant 0 : i32
    return %arg0, %c0_i32, %c0_i32_0 : i32, i32, i32
  }
}

</mosaic_0001>

<bundles_post_ra>
// kernel: tpu_custom_call.1
= control target key start
LH: loop header
LB: loop body
LE: loop exit
PB: predicated region body
PF: predicated region fallthrough
CT: control target
= control target key end

     0   :  { %10 = vsyncpa [#allocation5], 0  ;;  %s1433_s0 = inlined_call_operand.hbm [shape: bf16[2,16,64], index: 0, kind: input, shape index: {}]   ;;  %s1434_s1 = inlined_call_operand.hbm [shape: bf16[192,128], index: 1, kind: input, shape index: {}]   ;;  %s1435_s2 = inlined_call_operand.vmem [shape: f32[1,128], index: 2, kind: input, shape index: {}]   ;;  %s1436_s3 = inlined_call_operand.hbm [shape: bf16[384,256], index: 3, kind: input, shape index: {}]   ;;  %s1437_s4 = inlined_call_operand.vmem [shape: f32[1,256], index: 4, kind: input, shape index: {}]   ;;  %s1438_s5 = inlined_call_operand.hbm [shape: f32[2,16,256], index: 5, kind: output, shape index: {}]  }
   0x1   :  { %11 = vsyncpa [#allocation8], 0 }
   0x2   :  { %12 = vsyncpa [#allocation6], 0  ;;  %s1244_s18 = smov [#allocation7]   ;;  %s1245_s20 = smov [#allocation4]  }
   0x3   :  { %s30_s19 = sshll.u32 %s1244_s18, 4  ;;  %s18_s21 = sshll.u32 %s1245_s20, 4  ;;  %s31_s19 = int_to_ptr.vmem [resolvable:$true] %s30_s19  ;;  %s19_s21 = int_to_ptr.vmem [resolvable:$true] %s18_s21 }
   0x4   :  { %s1166_s22 = scalar_lea.vmem %s31_s19, 1536  ;;  %p1171_p1 = scmp.lt.s32.totalorder %s31_s19, %s31_s19 }
   0x5   :  { %p1167_p0 = scmp.ne.s32.totalorder %s31_s19, %s1166_s22  ;;  %p1172_p2 = scmp.lt.s32.totalorder %s1166_s22, %s1166_s22 }
   0x7   :  { %p1173_p3 = por %p1172_p2, %p1171_p1 }
   0x9   :  { %p1174_p4 = pnand %p1173_p3, %p1167_p0 }
   0xb   :  { %1177 = shalt.err (!%p1174_p4)
}
   0xc   :  { %s1246_s23 = smov 64   ;;  %s1247_s24 = smov 4  }
   0xd   :  { %36 = dma.hbm_to_vmem [thread:$0]  %s1434_s1, 1536, %s31_s19, [#allocation8], %s1246_s23, %s1246_s23, %s1247_s24  }
   0xe   :  { %s1186_s27 = scalar_lea.vmem %s19_s21, 256  ;;  %p1191_p6 = scmp.lt.s32.totalorder %s19_s21, %s19_s21 }
   0xf   :  { %p1187_p5 = scmp.ne.s32.totalorder %s19_s21, %s1186_s27  ;;  %p1192_p7 = scmp.lt.s32.totalorder %s1186_s27, %s1186_s27 }
  0x11   :  { %p1193_p8 = por %p1192_p7, %p1191_p6 }
  0x13   :  { %p1194_p9 = pnand %p1193_p8, %p1187_p5 }
  0x15   :  { %1197 = shalt.err (!%p1194_p9)
}
  0x16   :  { %24 = dma.hbm_to_vmem [thread:$0]  %s1433_s0, 256, %s19_s21, [#allocation5], %s1246_s23, %s1246_s23, %s1247_s24  }
  0x17   :  { %s1248_s30 = smov [#allocation9]  }
  0x18   :  { %s44_s6 = sshll.u32 %s1248_s30, 4  ;;  %s45_s6 = int_to_ptr.vmem [resolvable:$true] %s44_s6 }
  0x19   :  { %s1206_s7 = scalar_lea.vmem %s45_s6, 6144  ;;  %p1211_p11 = scmp.lt.s32.totalorder %s45_s6, %s45_s6 }
  0x1a   :  { %p1207_p10 = scmp.ne.s32.totalorder %s45_s6, %s1206_s7  ;;  %p1212_p12 = scmp.lt.s32.totalorder %s1206_s7, %s1206_s7 }
  0x1c   :  { %p1213_p13 = por %p1212_p12, %p1211_p11 }
  0x1e   :  { %p1214_p0 = pnand %p1213_p13, %p1207_p10 }
  0x20   :  { %1217 = shalt.err (!%p1214_p0)
}
  0x21   :  { %s1249_s1 = smov 128   ;;  %s1250_s8 = smov 8  }
  0x22   :  { %50 = dma.hbm_to_vmem [thread:$0]  %s1436_s3, 6144, %s45_s6, [#allocation8], %s1249_s1, %s1249_s1, %s1250_s8  }
  0x23   :  { %1238 = dma.done.wait [#allocation5], 256  }
  0x24   :  { %1239 = vsyncadd [#allocation5], 4294967040 }
  0x25   :  { %1240 = dma.done.wait [#allocation8], 7680  }
  0x26   :  { %1241 = vsyncadd [#allocation8], 4294959616  ;;  %vm67_vm0 = vcmask 516096   ;;  %vm68_vm1 = vsmask.f32 256  ;;  %v1251_v0 = vmov 0  }
  0x27   :  { %322 = vmatprep.subr.bf16.mxu0 %v1251_v0  ;;  %vm1300_vm2 = vmand %vm67_vm0, %vm68_vm1  ;;  %vm114_vm3 = vcmask 519168   ;;  %vm115_vm4 = vsmask.f32 7938  ;;  %vm147_vm5 = vsmask.f32 3328  ;;  %v1060_v26 = vld [vmem:[#allocation7 + $0x38] sm:$0xff]  }
  0x28   :  { %vm148_vm6 = vsmask.f32 7440  ;;  %v63_v2 = vld [vmem:[#allocation4] sm:$0xf]  ;;  %v70_v3 = vld [vmem:[#allocation2] sm:$0x1]  ;;  %vm1312_vm8 = vmand %vm114_vm3, %vm115_vm4  ;;  %323 = vmatpush1.bf16.msra.mxu0 %v1060_v26 }
  0x29   :  { %v65_v4 = vld [vmem:[#allocation4 + $0x8] sm:$0xf]  ;;  %v71_v5 = vsel %vm1300_vm2, 0, %v70_v3  ;;  %130 = vrot.lane.b32.xlu0 %v63_v2, %s1246_s23  ;;  %v79_v6 = vshrl.u32 %v63_v2, 16  ;;  %v82_v7 = vshll.u32 %v63_v2, 16  ;;  %vm1320_vm9 = vmor %vm147_vm5, %vm148_vm6  ;;  %v1061_v32 = vld [vmem:[#allocation7 + $0x30] sm:$0xff]   ;;  %324 = vmatprep.subr.bf16.mxu0 %v1251_v0 }
  0x2a   :  { %v73_v8 = vld [vmem:[#allocation2 + $0x10] sm:$0x1]  ;;  %134 = vrot.lane.b32.xlu1 %v65_v4, %s1246_s23  ;;  %v95_v9 = vshrl.u32 %v65_v4, 16  ;;  %72 = vst [vmem:[#allocation2] sm:$0x1] %v71_v5  ;;  %v98_v11 = vshll.u32 %v65_v4, 16  ;;  %vm1337_vm11 = vmand %vm114_vm3, %vm147_vm5 }
  0x2b   :  { %v74_v10 = vsel %vm1300_vm2, 0, %v73_v8  ;;  %v64_v12 = vld [vmem:[#allocation4 + $0x4] sm:$0xf]  ;;  %vm76_vm7 = vsmask.f32 4368  ;;  %v81_v13 = vrot.slane %v79_v6, 7 }
  0x2c   :  { %v150_v14 = vrot.slane %v79_v6, 4  ;;  %v151_v15 = vrot.slane %v82_v7, 5  ;;  %75 = vst [vmem:[#allocation2 + $0x10] sm:$0x1] %v74_v10  ;;  %v97_v16 = vrot.slane %v95_v9, 7  ;;  %v159_v19 = vrot.slane %v95_v9, 4  ;;  %vm1326_vm10 = vmor %vm68_vm1, %vm76_vm7  ;;  %325 = vmatpush1.bf16.msra.mxu0 %v1061_v32 }
  0x2d   :  { %v66_v17 = vld [vmem:[#allocation4 + $0xc] sm:$0xf]  ;;  %v160_v20 = vrot.slane %v98_v11, 5  ;;  %v87_v21 = vshrl.u32 %v64_v12, 16  ;;  %v90_v22 = vshll.u32 %v64_v12, 16  ;;  %v84_v23 = vor.u32 %v82_v7, %v81_v13  ;;  %132 = vrot.lane.b32.xlu0 %v64_v12, %s1246_s23  ;;  %v1062_v56 = vld [vmem:[#allocation7 + $0x28] sm:$0xff]   ;;  %326 = vmatprep.subr.bf16.mxu0 %v1251_v0 }
  0x2e   :  { %v85_v24 = vrot.slane %v81_v13, 4  ;;  %v152_v25 = vor.u32 %v151_v15, %v150_v14  ;;  %136 = vrot.lane.b32.xlu1 %v66_v17, %s1246_s23  ;;  %v100_v27 = vor.u32 %v98_v11, %v97_v16  ;;  %v103_v35 = vshrl.u32 %v66_v17, 16  ;;  %v174_v41 = vld [vmem:[#allocation2 + $0xc] sm:$0xf]  ;;  %v178_v59 = vld [vmem:[#allocation2 + $0x1c] sm:$0xf] }
  0x2f   :  { %v161_v28 = vor.u32 %v160_v20, %v159_v19  ;;  %v89_v29 = vrot.slane %v87_v21, 7  ;;  %v154_v31 = vrot.slane %v90_v22, 5  ;;  %v156_v34 = vrot.slane %v87_v21, 4  ;;  %v1063_v62 = vld [vmem:[#allocation7 + $0x20] sm:$0xff]   ;;  %v1064_v2 = vld [vmem:[#allocation7 + $0x18] sm:$0xff]   ;;  %v1065_v6 = vld [vmem:[#allocation7 + $0x10] sm:$0xff]  }
  0x30   :  { %v153_v33 = vrot.slane %v152_v25, 4  ;;  %v106_v36 = vshll.u32 %v66_v17, 16  ;;  %v101_v38 = vrot.slane %v97_v16, 4  ;;  %v105_v45 = vrot.slane %v103_v35, 7  ;;  %327 = vmatpush1.bf16.msra.mxu0 %v1062_v56  ;;  %v1078_v3 = vld [vmem:[#allocation9 + $0x74] ss:$8 sps:$4 sm:$0xff]  }
  0x31   :  { %v162_v39 = vrot.slane %v161_v28, 4  ;;  %v92_v40 = vor.u32 %v90_v22, %v89_v29  ;;  %v117_v42 = vld [vmem:[#allocation2] sm:$0xf]  ;;  %v157_v43 = vor.u32 %v156_v34, %v154_v31  ;;  %v165_v50 = vrot.slane %v103_v35, 4  ;;  %328 = vmatprep.subr.bf16.mxu0 %v1251_v0  ;;  %v1080_v4 = vld [vmem:[#allocation9 + $0x70] ss:$8 sps:$4 sm:$0xff]   ;;  %828 = vmatprep.subr.bf16.mxu1 %v1078_v3 }
  0x32   :  { %v155_v44 = vsel %vm1320_vm9, %v153_v33, %v154_v31  ;;  %v163_v46 = vrot.slane %v106_v36, 5  ;;  %v118_v47 = vsel %vm1312_vm8, %v84_v23, %v117_v42  ;;  %v108_v54 = vor.u32 %v106_v36, %v105_v45  ;;  %v1081_v7 = vld [vmem:[#allocation9 + $0x64] ss:$8 sps:$4 sm:$0xff]   ;;  %829 = vmatpush1.bf16.msra.mxu1 %v1080_v4  ;;  %v1083_v9 = vld [vmem:[#allocation9 + $0x60] ss:$8 sps:$4 sm:$0xff]   ;;  %v1068_v20 = vld [vmem:[#allocation7 + $0x58] sm:$0xff]  }
  0x33   :  { %v122_v48 = vld [vmem:[#allocation2 + $0x10] sm:$0xf]  ;;  %172 = vst.msk [vmem:[#allocation2 + $0x4] sm:$0xf] %vm114_vm3, %v155_v44  ;;  %v93_v51 = vsel %vm1326_vm10, %v85_v24, %v92_v40  ;;  %119 = vst [vmem:[#allocation2] sm:$0xf] %v118_v47  ;;  %830 = vmatprep.subr.bf16.mxu1 %v1081_v7 }
  0x34   :  { %v123_v52 = vsel %vm1312_vm8, %v100_v27, %v122_v48  ;;  %v158_v53 = vrot.slane %v157_v43, 4  ;;  %v164_v55 = vsel %vm1320_vm9, %v162_v39, %v163_v46  ;;  %121 = vst.msk [vmem:[#allocation2 + $0x8] sm:$0xf] %vm114_vm3, %v93_v51  ;;  %vm182_vm12 = vsmask.f32 7950  ;;  %329 = vmatpush1.bf16.msra.mxu0 %v1063_v62  ;;  %v1066_v14 = vld [vmem:[#allocation7 + $0x8] sm:$0xff]  }
  0x35   :  { %124 = vst [vmem:[#allocation2 + $0x10] sm:$0xf] %v123_v52  ;;  %v166_v57 = vor.u32 %v165_v50, %v163_v46  ;;  %177 = vst.msk [vmem:[#allocation2 + $0x14] sm:$0xf] %vm114_vm3, %v164_v55  ;;  %v109_v60 = vsel %vm1326_vm10, %v101_v38, %v108_v54  ;;  %vm181_vm13 = vcmask 519171   ;;  %330 = vmatprep.subr.bf16.mxu0 %v1251_v0  ;;  %v1067_v17 = vld [vmem:[#allocation7] sm:$0xff]  }
  0x36   :  { %v175_v58 = vsel %vm1337_vm11, %v158_v53, %v174_v41  ;;  %125 = vst.msk [vmem:[#allocation2 + $0x18] sm:$0xf] %vm114_vm3, %v109_v60  ;;  %vm1360_vm14 = vmand %vm181_vm13, %vm182_vm12  ;;  %v1084_v10 = vld [vmem:[#allocation9 + $0x54] ss:$8 sps:$4 sm:$0xff]   ;;  %831 = vmatpush1.bf16.msra.mxu1 %v1083_v9  ;;  %v1086_v13 = vld [vmem:[#allocation9 + $0x50] ss:$8 sps:$4 sm:$0xff]  }
  0x37   :  { %176 = vst [vmem:[#allocation2 + $0xc] sm:$0xf] %v175_v58  ;;  %v167_v61 = vrot.slane %v166_v57, 4  ;;  %832 = vmatprep.subr.bf16.mxu1 %v1084_v10  ;;  %v1087_v15 = vld [vmem:[#allocation9 + $0x44] ss:$8 sps:$4 sm:$0xff]   ;;  %v1069_v23 = vld [vmem:[#allocation7 + $0x50] sm:$0xff]  }
  0x38   :  { %331 = vmatpush1.bf16.msra.mxu0 %v1064_v2  ;;  %v1089_v16 = vld [vmem:[#allocation9 + $0x40] ss:$8 sps:$4 sm:$0xff]   ;;  %v1090_v18 = vld [vmem:[#allocation9 + $0x34] ss:$8 sps:$4 sm:$0xff]   ;;  %v1092_v19 = vld [vmem:[#allocation9 + $0x30] ss:$8 sps:$4 sm:$0xff]  }
  0x39   :  { %v179_v63 = vsel %vm1337_vm11, %v167_v61, %v178_v59  ;;  %332 = vmatprep.subr.bf16.mxu0 %v1251_v0  ;;  %v1093_v21 = vld [vmem:[#allocation9 + $0x24] ss:$8 sps:$4 sm:$0xff]   ;;  %v1095_v22 = vld [vmem:[#allocation9 + $0x20] ss:$8 sps:$4 sm:$0xff]   ;;  %v1096_v24 = vld [vmem:[#allocation9 + $0x14] ss:$8 sps:$4 sm:$0xff]  }
  0x3a   :  { %180 = vst [vmem:[#allocation2 + $0x1c] sm:$0xf] %v179_v63  ;;  %833 = vmatpush1.bf16.msra.mxu1 %v1086_v13  ;;  %v1098_v25 = vld [vmem:[#allocation9 + $0x10] ss:$8 sps:$4 sm:$0xff]   ;;  %v1070_v26 = vld [vmem:[#allocation7 + $0x48] sm:$0xff]   ;;  %v1071_v29 = vld [vmem:[#allocation7 + $0x40] sm:$0xff]  }
  0x3b   :  { %834 = vmatprep.subr.bf16.mxu1 %v1087_v15  ;;  %v1099_v27 = vld [vmem:[#allocation9 + $0x4] ss:$8 sps:$4 sm:$0xff]   ;;  %v1101_v28 = vld [vmem:[#allocation9] ss:$8 sps:$4 sm:$0xff]   ;;  %v1102_v31 = vld [vmem:[#allocation9 + $0xf4] ss:$8 sps:$4 sm:$0xff]  }
  0x3c   :  { %333 = vmatpush1.bf16.msra.mxu0 %v1065_v6  ;;  %v1104_v32 = vld [vmem:[#allocation9 + $0xf0] ss:$8 sps:$4 sm:$0xff]   ;;  %vm142_vm15 = vcmask 1043968   ;;  %vm315_vm0 = vcmask 523264   ;;  %v1105_v42 = vld [vmem:[#allocation9 + $0xe4] ss:$8 sps:$4 sm:$0xff]  }
  0x3d   :  { %334 = vmatprep.subr.bf16.mxu0 %v1251_v0  ;;  %v1107_v43 = vld [vmem:[#allocation9 + $0xe0] ss:$8 sps:$4 sm:$0xff]   ;;  %vm377_vm2 = vcmask 1040384   ;;  %v1108_v46 = vld [vmem:[#allocation9 + $0xd4] ss:$8 sps:$4 sm:$0xff]  }
  0x3e   :  { %v184_v5 = vld [vmem:[#allocation2 + $0xc] sm:$0x8]  ;;  %835 = vmatpush1.bf16.msra.mxu1 %v1089_v16  ;;  %vm1378_vm3 = vmand %vm377_vm2, %vm68_vm1  ;;  %v379_v45 = vld [vmem:[#allocation3] sm:$0x1]  ;;  %vm431_vm1 = vcmask 1043456  }
  0x3f   :  { %v185_v8 = vsel %vm1360_vm14, 0, %v184_v5  ;;  %836 = vmatprep.subr.bf16.mxu1 %v1090_v18  ;;  %v380_v47 = vsel %vm1378_vm3, 0, %v379_v45  ;;  %v1110_v48 = vld [vmem:[#allocation9 + $0xd0] ss:$8 sps:$4 sm:$0xff]   ;;  %v1113_v49 = vld [vmem:[#allocation9 + $0x174] ss:$8 sps:$4 sm:$0xff]   ;;  %vm1391_vm6 = vmand %vm431_vm1, %vm115_vm4 }
  0x40   :  { %186 = vst [vmem:[#allocation2 + $0xc] sm:$0x8] %v185_v8  ;;  %335 = vmatpush1.bf16.msra.mxu0 %v1066_v14  ;;  %381 = vst [vmem:[#allocation3] sm:$0x1] %v380_v47  ;;  %v1111_v50 = vld [vmem:[#allocation9 + $0x170] ss:$8 sps:$4 sm:$0xff]  }
  0x41   :  { %v187_v11 = vld [vmem:[#allocation2 + $0x1c] sm:$0x8]  ;;  %336 = vmatprep.subr.bf16.mxu0 %v1251_v0  ;;  %v1114_v51 = vld [vmem:[#allocation9 + $0xc4] ss:$8 sps:$4 sm:$0xff]   ;;  %v1116_v52 = vld [vmem:[#allocation9 + $0xc0] ss:$8 sps:$4 sm:$0xff]  }
  0x42   :  { %v188_v12 = vsel %vm1360_vm14, 0, %v187_v11  ;;  %837 = vmatpush1.bf16.msra.mxu1 %v1092_v19  ;;  %v1119_v53 = vld [vmem:[#allocation9 + $0x164] ss:$8 sps:$4 sm:$0xff]   ;;  %v1117_v54 = vld [vmem:[#allocation9 + $0x160] ss:$8 sps:$4 sm:$0xff]   ;;  %vm1401_vm4 = vmand %vm431_vm1, %vm147_vm5  ;;  %vm480_vm5 = vcmask 1043459  }
  0x43   :  { %189 = vst [vmem:[#allocation2 + $0x1c] sm:$0x8] %v188_v12  ;;  %838 = vmatprep.subr.bf16.mxu1 %v1093_v21  ;;  %v382_v55 = vld [vmem:[#allocation3 + $0x18] sm:$0x1]  ;;  %v1120_v57 = vld [vmem:[#allocation9 + $0xb4] ss:$8 sps:$4 sm:$0xff]   ;;  %vm1414_vm7 = vmand %vm480_vm5, %vm182_vm12 }
  0x44   :  { %337 = vmatpush1.bf16.msra.mxu0 %v1067_v17  ;;  %v383_v56 = vsel %vm1378_vm3, 0, %v382_v55  ;;  %v1122_v58 = vld [vmem:[#allocation9 + $0xb0] ss:$8 sps:$4 sm:$0xff]   ;;  %v1125_v59 = vld [vmem:[#allocation9 + $0x154] ss:$8 sps:$4 sm:$0xff]  }
  0x45   :  { %346 = vmatprep.subr.bf16.mxu0 %v1251_v0  ;;  %384 = vst [vmem:[#allocation3 + $0x18] sm:$0x1] %v383_v56  ;;  %v1123_v60 = vld [vmem:[#allocation9 + $0x150] ss:$8 sps:$4 sm:$0xff]   ;;  %v1126_v61 = vld [vmem:[#allocation9 + $0xa4] ss:$8 sps:$4 sm:$0xff]  }
  0x46   :  { %839 = vmatpush1.bf16.msra.mxu1 %v1095_v22  ;;  %v1128_v62 = vld [vmem:[#allocation9 + $0xa0] ss:$8 sps:$4 sm:$0xff]   ;;  %v1131_v63 = vld [vmem:[#allocation9 + $0x144] ss:$8 sps:$4 sm:$0xff]   ;;  %v1132_v2 = vld [vmem:[#allocation9 + $0x94] ss:$8 sps:$4 sm:$0xff]  }
  0x47   :  { %840 = vmatprep.subr.bf16.mxu1 %v1096_v24  ;;  %v1074_v39 = vld [vmem:[#allocation2 + $0x4] ss:$8 sps:$4 sm:$0xff]   ;;  %v1129_v1 = vld [vmem:[#allocation9 + $0x140] ss:$8 sps:$4 sm:$0xff]   ;;  %v1134_v3 = vld [vmem:[#allocation9 + $0x90] ss:$8 sps:$4 sm:$0xff]  }
  0x48   :  { %347 = vmatpush2.bf16.msra.mxu0 %v1068_v20  ;;  %985 = vmatprep.mubr.msk.bf16.mxu0 %vm315_vm0, %v1074_v39  ;;  %v1137_v4 = vld [vmem:[#allocation9 + $0x134] ss:$8 sps:$4 sm:$0xff]   ;;  %v1135_v5 = vld [vmem:[#allocation9 + $0x130] ss:$8 sps:$4 sm:$0xff]   ;;  %v1138_v6 = vld [vmem:[#allocation9 + $0x84] ss:$8 sps:$4 sm:$0xff]  }
  0x49   :  { %348 = vmatprep.subr.bf16.mxu0 %v1251_v0  ;;  %v1140_v7 = vld [vmem:[#allocation9 + $0x80] ss:$8 sps:$4 sm:$0xff]   ;;  %v1143_v8 = vld [vmem:[#allocation9 + $0x124] ss:$8 sps:$4 sm:$0xff]   ;;  %v1149_v10 = vld [vmem:[#allocation9 + $0x114] ss:$8 sps:$4 sm:$0xff]  }
  0x4a   :  { %841 = vmatpush1.bf16.msra.mxu1 %v1098_v25  ;;  %v1075_v40 = vld [vmem:[#allocation2 + $0x14] ss:$8 sps:$4 sm:$0xff]   ;;  %v1141_v9 = vld [vmem:[#allocation9 + $0x120] ss:$8 sps:$4 sm:$0xff]   ;;  %v1147_v11 = vld [vmem:[#allocation9 + $0x110] ss:$8 sps:$4 sm:$0xff]  }
  0x4b   :  { %842 = vmatprep.subr.bf16.mxu1 %v1099_v27  ;;  %v1152_v12 = vld [vmem:[#allocation9 + $0x104] ss:$8 sps:$4 sm:$0xff]   ;;  %v1150_v13 = vld [vmem:[#allocation9 + $0x100] ss:$8 sps:$4 sm:$0xff]  }
  0x4c   :  { %349 = vmatpush2.bf16.msra.mxu0 %v1069_v23  ;;  %v968_v14 = vld [vmem:[%s1435_s2] ss:$0 sm:$0xff] }
  0x4d   :  { %350 = vmatprep.subr.bf16.mxu0 %v1251_v0 }
  0x4e   :  { %843 = vmatpush1.bf16.msra.mxu1 %v1101_v28 }
  0x4f   :  { %844 = vmatprep.subr.bf16.mxu1 %v1102_v31 }
  0x50   :  { %351 = vmatpush2.bf16.msra.mxu0 %v1070_v26 }
  0x51   :  { %352 = vmatprep.subr.bf16.mxu0 %v1251_v0 }
  0x52   :  { %845 = vmatpush2.bf16.msra.mxu1 %v1104_v32  ;;  %v546_v32 = vlaneseq }
  0x53   :  { %846 = vmatprep.subr.bf16.mxu1 %v1105_v42 }
  0x54   :  { %353 = vmatpush2.bf16.msra.mxu0 %v1071_v29 }
  0x55   :  { %881 = vmatprep.subr.bf16.mxu0 %v1113_v49 }
  0x56   :  { %847 = vmatpush2.bf16.msra.mxu1 %v1107_v43 }
  0x57   :  { %848 = vmatprep.subr.bf16.mxu1 %v1108_v46 }
  0x5a   :  { %849 = vmatpush2.bf16.msra.mxu1 %v1110_v48 }
  0x5b   :  { %850 = vmatprep.subr.bf16.mxu1 %v1114_v51 }
  0x5e   :  { %851 = vmatpush2.bf16.msra.mxu1 %v1116_v52 }
  0x5f   :  { %852 = vmatprep.subr.bf16.mxu1 %v1120_v57 }
  0x62   :  { %853 = vmatpush2.bf16.msra.mxu1 %v1122_v58 }
  0x63   :  { %854 = vmatprep.subr.bf16.mxu1 %v1126_v61 }
  0x66   :  { %855 = vmatpush2.bf16.msra.mxu1 %v1128_v62 }
  0x67   :  { %856 = vmatprep.subr.bf16.mxu1 %v1132_v2  ;;  %v437_v2 = vld [vmem:[#allocation3 + $0x18] sm:$0xf] }
  0x6a   :  { %857 = vmatpush2.bf16.msra.mxu1 %v1134_v3 }
  0x6b   :  { %858 = vmatprep.subr.bf16.mxu1 %v1138_v6 }
  0x6e   :  { %859 = vmatpush2.bf16.msra.mxu1 %v1140_v7 }
  0x9b   :  { %v131_v33 = vpop.permute.xlu0 %130 }
  0x9c   :  { %v135_v34 = vpop.permute.xlu1 %134  ;;  %143 = vst.msk [vmem:[#allocation2] sm:$0xf] %vm142_vm15, %v131_v33  ;;  %v433_v33 = vld [vmem:[#allocation3] sm:$0xf] }
  0x9d   :  { %145 = vst.msk [vmem:[#allocation2 + $0x10] sm:$0xf] %vm142_vm15, %v135_v34 }
  0x9f   :  { %v133_v35 = vpop.permute.xlu0 %132 }
  0xa0   :  { %v137_v36 = vpop.permute.xlu1 %136  ;;  %144 = vst.msk [vmem:[#allocation2 + $0x8] sm:$0xf] %vm142_vm15, %v133_v35 }
  0xa1   :  { %146 = vst.msk [vmem:[#allocation2 + $0x18] sm:$0xf] %vm142_vm15, %v137_v36 }
  0xa7   :  { %v1072_v38 = vld [vmem:[#allocation2] ss:$8 sps:$4 sm:$0xff]  }
  0xa8   :  { %355 = vmatmul.mubr.bf16.vlgmr.msra.gmra.mxu0 %v1072_v38  ;;  %v1077_v41 = vld [vmem:[#allocation2 + $0x10] ss:$8 sps:$4 sm:$0xff]  }
  0xa9   :  { %986 = vmatprep.mubr.msk.bf16.mxu0 %vm315_vm0, %v1075_v40  ;;  %882 = vmatpush1.bf16.msra.mxu0 %v1111_v50 }
  0xaa   :  { %883 = vmatprep.subr.bf16.mxu0 %v1119_v53 }
  0xad   :  { %884 = vmatpush1.bf16.msra.mxu0 %v1117_v54 }
  0xae   :  { %885 = vmatprep.subr.bf16.mxu0 %v1125_v59  ;;  %v473_v59 = vld [vmem:[#allocation3 + $0x14] sm:$0xf] }
  0xb0   :  { %363 = vmatmul.mubr.bf16.gmra.mxu0 %v1077_v41 }
  0xb1   :  { %913 = vmatprep.mubr.bf16.mxu0 %v1251_v0  ;;  %886 = vmatpush1.bf16.msra.mxu0 %v1123_v60 }
  0xb2   :  { %887 = vmatprep.subr.bf16.mxu0 %v1131_v63 }
  0xb5   :  { %888 = vmatpush1.bf16.msra.mxu0 %v1129_v1 }
  0xb6   :  { %889 = vmatprep.subr.bf16.mxu0 %v1137_v4 }
  0xb9   :  { %890 = vmatpush1.bf16.msra.mxu0 %v1135_v5 }
  0xba   :  { %891 = vmatprep.subr.bf16.mxu0 %v1143_v8 }
  0xbd   :  { %892 = vmatpush1.bf16.msra.mxu0 %v1141_v9 }
  0xbe   :  { %893 = vmatprep.subr.bf16.mxu0 %v1149_v10 }
  0xc1   :  { %894 = vmatpush1.bf16.msra.mxu0 %v1147_v11 }
  0xc2   :  { %895 = vmatprep.subr.bf16.mxu0 %v1152_v12 }
  0xc5   :  { %896 = vmatpush1.bf16.msra.mxu0 %v1150_v13 }
 0x168   :  { %v356_v15 = vpop.f32.mrf.mxu0 }
 0x169   :  { %v357_v16 = vadd.f32 %v968_v14, %v356_v15 }
 0x16a   :  { %v358_v17 = vpop.f32.mrf.mxu0 }
 0x16b   :  { %v371_v18 = vmax.f32 %v357_v16, 0.0 }
 0x16c   :  { %v359_v19 = vpop.f32.mrf.mxu0 }
 0x16d   :  { %v1045_v20 = vpack.c.bf16 %v371_v18, %v371_v18  ;;  %v360_v21 = vadd.f32 %v968_v14, %v359_v19 }
 0x16e   :  { %v361_v22 = vpop.f32.mrf.mxu0 }
 0x16f   :  { %v396_v23 = vshrl.u32 %v1045_v20, 16  ;;  %v399_v24 = vshll.u32 %v1045_v20, 16  ;;  %445 = vst [vmem:[#allocation3 + $0x4] sm:$0xf] %v1045_v20  ;;  %v372_v25 = vmax.f32 %v360_v21, 0.0 }
 0x170   :  { %v364_v26 = vpop.f32.mrf.mxu0  ;;  %v477_v21 = vld [vmem:[#allocation3 + $0x2c] sm:$0xf] }
 0x171   :  { %v398_v27 = vrot.slane %v396_v23, 7  ;;  %v449_v28 = vrot.slane %v396_v23, 4  ;;  %v450_v29 = vrot.slane %v399_v24, 5  ;;  %v1046_v31 = vpack.c.bf16 %v372_v25, %v372_v25 }
 0x172   :  { %v365_v34 = vadd.f32 %v968_v14, %v364_v26  ;;  %v366_v35 = vpop.f32.mrf.mxu0 }
 0x173   :  { %v401_v36 = vor.u32 %v399_v24, %v398_v27  ;;  %v451_v38 = vor.u32 %v450_v29, %v449_v28  ;;  %v404_v39 = vshrl.u32 %v1046_v31, 16  ;;  %446 = vst [vmem:[#allocation3 + $0x10] sm:$0xf] %v1046_v31  ;;  %v407_v40 = vshll.u32 %v1046_v31, 16 }
 0x174   :  { %v373_v41 = vmax.f32 %v365_v34, 0.0  ;;  %v367_v42 = vpop.f32.mrf.mxu0  ;;  %v402_v51 = vrot.slane %v398_v27, 4 }
 0x175   :  { %v434_v43 = vsel %vm1391_vm6, %v401_v36, %v433_v33  ;;  %v452_v44 = vrot.slane %v451_v38, 4  ;;  %v406_v45 = vrot.slane %v404_v39, 7  ;;  %v455_v46 = vrot.slane %v404_v39, 4  ;;  %v544_v38 = vld [vmem:[%s1437_s4] sm:$0x3]  ;;  %s1252_s4 = smov [#allocation10]  }
 0x176   :  { %435 = vst [vmem:[#allocation3] sm:$0xf] %v434_v43  ;;  %v453_v47 = vrot.slane %v407_v40, 5  ;;  %v1047_v48 = vpack.c.bf16 %v373_v41, %v373_v41  ;;  %v368_v49 = vadd.f32 %v968_v14, %v367_v42  ;;  %v369_v50 = vpop.f32.mrf.mxu0  ;;  %v547_v33 = vshrl.u32 %v546_v32, 7  ;;  %s955_s12 = sshll.u32 %s1252_s4, 4  ;;  %s956_s12 = int_to_ptr.vmem [resolvable:$true] %s955_s12 }
 0x177   :  { %v409_v52 = vor.u32 %v407_v40, %v406_v45  ;;  %s1218_s13 = scalar_lea.vmem %s956_s12, 1024  ;;  %p1223_p2 = scmp.lt.s32.totalorder %s956_s12, %s956_s12 }
 0x178   :  { %v454_v53 = vsel %vm1320_vm9, %v452_v44, %v453_v47  ;;  %v456_v54 = vor.u32 %v455_v46, %v453_v47  ;;  %v412_v55 = vshrl.u32 %v1047_v48, 16  ;;  %v415_v56 = vshll.u32 %v1047_v48, 16  ;;  %447 = vst [vmem:[#allocation3 + $0x1c] sm:$0xf] %v1047_v48  ;;  %p1219_p1 = scmp.ne.s32.totalorder %s956_s12, %s1218_s13  ;;  %p1224_p3 = scmp.lt.s32.totalorder %s1218_s13, %s1218_s13 }
 0x179   :  { %v410_v58 = vsel %vm1326_vm10, %v402_v51, %v409_v52  ;;  %471 = vst [vmem:[#allocation3 + $0x8] sm:$0xf] %v454_v53  ;;  %v374_v60 = vmax.f32 %v368_v49, 0.0  ;;  %v548_v35 = vsub.s32 0, %v547_v33  ;;  %v552_v39 = vsub.s32 1, %v547_v33 }
 0x17a   :  { %436 = vst [vmem:[#allocation3 + $0xc] sm:$0xf] %v410_v58  ;;  %v457_v61 = vrot.slane %v456_v54, 4  ;;  %v414_v62 = vrot.slane %v412_v55, 7  ;;  %v458_v63 = vrot.slane %v412_v55, 4  ;;  %v459_v1 = vrot.slane %v415_v56, 5  ;;  %p1225_p4 = por %p1224_p3, %p1223_p2 }
 0x17b   :  { %v1048_v3 = vpack.c.bf16 %v374_v60, %v374_v60  ;;  %v1146_v19 = vld [vmem:[#allocation3 + $0x4] ss:$12 sps:$4 sm:$0xff]   ;;  %v549_v41 = vrot.slane %v544_v38, %v548_v35  ;;  %v553_v43 = vrot.slane %v544_v38, %v552_v39 }
 0x17c   :  { %v474_v4 = vsel %vm1401_vm4, %v457_v61, %v473_v59  ;;  %v417_v5 = vor.u32 %v415_v56, %v414_v62  ;;  %v460_v6 = vor.u32 %v459_v1, %v458_v63  ;;  %v418_v14 = vrot.slane %v414_v62, 4  ;;  %860 = vmatprep.mubr.bf16.mxu1 %v1146_v19  ;;  %p1226_p5 = pnand %p1225_p4, %p1219_p1 }
 0x17d   :  { %475 = vst [vmem:[#allocation3 + $0x14] sm:$0xf] %v474_v4  ;;  %v420_v7 = vshrl.u32 %v1048_v3, 16  ;;  %v423_v8 = vshll.u32 %v1048_v3, 16  ;;  %448 = vst [vmem:[#allocation3 + $0x28] sm:$0xf] %v1048_v3 }
 0x17e   :  { %v438_v9 = vsel %vm1391_vm6, %v417_v5, %v437_v2  ;;  %v461_v10 = vrot.slane %v460_v6, 4 }
 0x17f   :  { %439 = vst [vmem:[#allocation3 + $0x18] sm:$0xf] %v438_v9  ;;  %v422_v11 = vrot.slane %v420_v7, 7  ;;  %v462_v12 = vrot.slane %v423_v8, 5  ;;  %v464_v13 = vrot.slane %v420_v7, 4 }
 0x181   :  { %v425_v15 = vor.u32 %v423_v8, %v422_v11  ;;  %v463_v16 = vsel %vm1320_vm9, %v461_v10, %v462_v12  ;;  %v465_v17 = vor.u32 %v464_v13, %v462_v12  ;;  %v1144_v18 = vld [vmem:[#allocation3] ss:$12 sps:$4 sm:$0xff]  }
 0x182   :  { %476 = vst [vmem:[#allocation3 + $0x20] sm:$0xf] %v463_v16  ;;  %861 = vmatmul.mubr.bf16.vlgmr.msra.gmra.mxu1 %v1144_v18 }
 0x183   :  { %v426_v22 = vsel %vm1326_vm10, %v418_v14, %v425_v15  ;;  %v466_v23 = vrot.slane %v465_v17, 4 }
 0x184   :  { %v482_v24 = vld [vmem:[#allocation3 + $0x14] sm:$0x8]  ;;  %440 = vst [vmem:[#allocation3 + $0x24] sm:$0xf] %v426_v22  ;;  %v1153_v26 = vld [vmem:[#allocation3 + $0x1c] ss:$12 sps:$4 sm:$0xff]  }
 0x185   :  { %v483_v30 = vsel %vm1414_vm7, 0, %v482_v24  ;;  %v478_v25 = vsel %vm1401_vm4, %v466_v23, %v477_v21  ;;  %870 = vmatprep.mubr.bf16.mxu1 %v1153_v26 }
 0x186   :  { %484 = vst [vmem:[#allocation3 + $0x14] sm:$0x8] %v483_v30  ;;  %479 = vst [vmem:[#allocation3 + $0x2c] sm:$0xf] %v478_v25 }
 0x18b   :  { %v1155_v27 = vld [vmem:[#allocation3 + $0x18] ss:$12 sps:$4 sm:$0xff]  }
 0x18c   :  { %871 = vmatmul.mubr.bf16.gmra.mxu1 %v1155_v27 }
 0x18d   :  { %v485_v28 = vld [vmem:[#allocation3 + $0x2c] sm:$0x8]  ;;  %v1156_v29 = vld [vmem:[#allocation3 + $0x8] ss:$12 sps:$4 sm:$0xff]  }
 0x18e   :  { %v486_v37 = vsel %vm1414_vm7, 0, %v485_v28  ;;  %914 = vmatmul.mubr.bf16.vlgmr.msra.gmra.mxu0 %v1156_v29 }
 0x18f   :  { %487 = vst [vmem:[#allocation3 + $0x2c] sm:$0x8] %v486_v37  ;;  %923 = vmatprep.mubr.bf16.mxu0 %v1251_v0 }
 0x196   :  { %v1157_v31 = vld [vmem:[#allocation3 + $0x20] ss:$12 sps:$4 sm:$0xff]  }
 0x197   :  { %924 = vmatmul.mubr.bf16.gmra.mxu0 %v1157_v31 }
 0x242   :  { %v862_v34 = vpop.f32.mrf.mxu1 }
 0x243   :  { %v863_v44 = vadd.f32 %v862_v34, %v549_v41 }
 0x244   :  { %v864_v36 = vpop.f32.mrf.mxu1 }
 0x245   :  { %v865_v0 = vadd.f32 %v864_v36, %v553_v43 }
 0x246   :  { %v866_v40 = vpop.f32.mrf.mxu1 }
 0x247   :  { %v867_v49 = vadd.f32 %v866_v40, %v549_v41 }
 0x248   :  { %v868_v42 = vpop.f32.mrf.mxu1 }
 0x249   :  { %v869_v54 = vadd.f32 %v868_v42, %v553_v43 }
 0x24c   :  { %v872_v45 = vpop.f32.mrf.mxu1 }
 0x24d   :  { %v873_v61 = vadd.f32 %v872_v45, %v549_v41 }
 0x24e   :  { %v915_v46 = vpop.f32.mrf.mxu0  ;;  %v874_v50 = vpop.f32.mrf.mxu1 }
 0x24f   :  { %v916_v47 = vadd.f32 %v915_v46, %v863_v44  ;;  %v875_v1 = vadd.f32 %v874_v50, %v553_v43 }
 0x250   :  { %v917_v48 = vpop.f32.mrf.mxu0  ;;  %v876_v58 = vpop.f32.mrf.mxu1 }
 0x251   :  { %v934_v51 = vmax.f32 %v916_v47, 0.0  ;;  %v918_v52 = vadd.f32 %v917_v48, %v865_v0  ;;  %v877_v5 = vadd.f32 %v876_v58, %v549_v41 }
 0x252   :  { %v919_v53 = vpop.f32.mrf.mxu0  ;;  %v878_v3 = vpop.f32.mrf.mxu1 }
 0x253   :  { %942 = vst [vmem:[#allocation10] sm:$0xff] %v934_v51  ;;  %v935_v55 = vmax.f32 %v918_v52, 0.0  ;;  %v920_v56 = vadd.f32 %v919_v53, %v867_v49  ;;  %v879_v9 = vadd.f32 %v878_v3, %v553_v43 }
 0x254   :  { %v921_v57 = vpop.f32.mrf.mxu0 }
 0x255   :  { %943 = vst [vmem:[#allocation10 + $0x8] sm:$0xff] %v935_v55  ;;  %v936_v59 = vmax.f32 %v920_v56, 0.0  ;;  %v922_v60 = vadd.f32 %v921_v57, %v869_v54 }
 0x257   :  { %944 = vst [vmem:[#allocation10 + $0x10] sm:$0xff] %v936_v59  ;;  %v937_v62 = vmax.f32 %v922_v60, 0.0  ;;  %v925_v63 = vpop.f32.mrf.mxu0 }
 0x258   :  { %v926_v2 = vadd.f32 %v925_v63, %v873_v61 }
 0x259   :  { %945 = vst [vmem:[#allocation10 + $0x18] sm:$0xff] %v937_v62  ;;  %v927_v4 = vpop.f32.mrf.mxu0 }
 0x25a   :  { %v938_v6 = vmax.f32 %v926_v2, 0.0  ;;  %v928_v7 = vadd.f32 %v927_v4, %v875_v1 }
 0x25b   :  { %v929_v8 = vpop.f32.mrf.mxu0 }
 0x25c   :  { %946 = vst [vmem:[#allocation10 + $0x20] sm:$0xff] %v938_v6  ;;  %v939_v10 = vmax.f32 %v928_v7, 0.0  ;;  %v930_v11 = vadd.f32 %v929_v8, %v877_v5 }
 0x25d   :  { %v931_v12 = vpop.f32.mrf.mxu0 }
 0x25e   :  { %947 = vst [vmem:[#allocation10 + $0x28] sm:$0xff] %v939_v10  ;;  %v940_v13 = vmax.f32 %v930_v11, 0.0  ;;  %v932_v14 = vadd.f32 %v931_v12, %v879_v9 }
 0x260   :  { %948 = vst [vmem:[#allocation10 + $0x30] sm:$0xff] %v940_v13  ;;  %v941_v15 = vmax.f32 %v932_v14, 0.0 }
 0x262   :  { %949 = vst [vmem:[#allocation10 + $0x38] sm:$0xff] %v941_v15 }
 0x263   :  { %1229 = shalt.err (!%p1226_p5)
}
 0x264   :  { %s1253_s14 = smov 256   ;;  %s1254_s15 = smov 16  }
 0x265   :  { %961 = dma.vmem_to_hbm [thread:$0]  %s956_s12, 1024, %s1438_s5, [#allocation6], %s1253_s14, %s1253_s14, %s1254_s15  }
 0x266   :  { %1242 = dma.done.wait [#allocation6], 1024  }
 0x267   :  { %1243 = vsyncadd [#allocation6], 4294966272 }
 0x268   :  { %965 = vsyncpa [#allocation5], 1 }
 0x269   :  { %966 = vsyncpa [#allocation8], 1 }
 0x26a   :  { %967 = vsyncpa [#allocation6], 1 }

</bundles_post_ra>
